<compile_context>
chip_gen: v7x
topology: tpu7x:2x2x1
jax: 0.10.0
libtpu: 0.0.40
codegen_flags: <defaults>
</compile_context>

<pallas_src>
import jax
import jax.numpy as jnp
from jax.experimental import pallas as pl
from jax.experimental.pallas import tpu as pltpu


def _round_up(x, m):
    return ((x + m - 1) // m) * m


def _cdiv(a, b):
    return (a + b - 1) // b


def _choose_batch_tile(B):
    """Pick the batch tile TB.

    B <= 128: a single grid step (per-step overhead would dominate otherwise),
    rounded up for sublane packing (16 rows for bf16 when it matters).
    B  > 128: large tiles to amortize pipeline overhead, but always >= 2 grid
    steps so v7x's two TensorCores can split the "parallel" batch axis;
    capped at 512 rows (whole working set is still << VMEM).
    """
    if B <= 128:
        mult = 16 if B > 16 else 8
        return _round_up(max(B, 1), mult)
    return min(512, _round_up(_cdiv(B, 2), 16))


# ----------------------------------------------------------------------------
# Kernel: 5 chained MXU matmuls per batch tile; weights resident; two
# interleaved sub-tiles so MXU (matmul) and VPU (bias/ReLU/cast) overlap.
# ----------------------------------------------------------------------------
def agent_network_fc_kernel(x_ref, w_ref, b_ref, out_ref):
    TB, F = x_ref.shape                 # static block shape
    L = w_ref.shape[0]                  # static (5 after fusion)
    num_acts = out_ref.shape[1]
    cdt = w_ref.dtype                   # bf16 compute dtype for MXU inputs

    # Two independent sub-tile dependency chains in one basic block lets the
    # scheduler co-issue one chain's vmatmul with the other's VALU work.
    n_sub = 2 if (TB % 16 == 0 and TB >= 32) else 1
    sub = TB // n_sub

    # Load input tile once, cast to bf16 in-kernel (no wrapper pad/cast pass).
    x_all = x_ref[...].astype(cdt)                       # (TB, F)
    hs = [x_all[s * sub:(s + 1) * sub, :] for s in range(n_sub)]

    # Layer 0: contract only the true feature width F of the packed weight.
    w0 = w_ref[0][:F, :]                                 # (F, P) bf16
    b0 = b_ref[0]                                        # (1, P) f32
    hs = [
        jnp.maximum(jnp.dot(h, w0, preferred_element_type=jnp.float32) + b0,
                    0.0).astype(cdt)
        for h in hs
    ]

    # Hidden layers 1 .. L-2: Linear -> bias (f32) -> ReLU -> cast to bf16.
    for l in range(1, L - 1):
        wl = w_ref[l]
        bl = b_ref[l]
        hs = [
            jnp.maximum(jnp.dot(h, wl, preferred_element_type=jnp.float32) + bl,
                        0.0).astype(cdt)
            for h in hs
        ]

    # Final fused (gnn_out -> logits) layer, no activation, f32 output.
    wL = w_ref[L - 1]
    bL = b_ref[L - 1]
    outs = [jnp.dot(h, wL, preferred_element_type=jnp.float32) + bL for h in hs]
    res = outs[0] if n_sub == 1 else jnp.concatenate(outs, axis=0)
    out_ref[...] = res[:, :num_acts]    # slice fused into the kernel store


# ----------------------------------------------------------------------------
# Param prep: fuse ReLU-free Linear pairs, pad to P lanes, pack, cast to bf16.
# ----------------------------------------------------------------------------
def prepare_packed_params(params, compute_dtype=jnp.bfloat16):
    """params: 7 tuples (W_t (in,out) f32, b (1,out) f32) in module order.

    Returns (w_stack (L,P,P) compute_dtype, b_stack (L,1,P) f32, num_acts).
    """
    (w1, b1), (w2, b2), (w3, b3), (w4, b4), (w5, b5), (w6, b6), (w7, b7) = params

    # Fuse Linear3 -> Linear4 (no ReLU between) and Linear6 -> Linear7.
    w34 = w3 @ w4
    b34 = b3 @ w4 + b4
    w67 = w6 @ w7
    b67 = b6 @ w7 + b7

    fused = [(w1, b1), (w2, b2), (w34, b34), (w5, b5), (w67, b67)]
    num_acts = w7.shape[1]

    max_dim = max(max(w.shape) for w, _ in fused)
    P = _round_up(max(max_dim, 128), 128)      # lane-aligned common width
    L = len(fused)

    w_stack = jnp.zeros((L, P, P), compute_dtype)
    b_stack = jnp.zeros((L, 1, P), jnp.float32)
    for l, (w, b) in enumerate(fused):
        ki, ko = w.shape
        w_stack = w_stack.at[l, :ki, :ko].set(w.astype(compute_dtype))
        b_stack = b_stack.at[l, 0, :ko].set(b[0].astype(jnp.float32))
    return w_stack, b_stack, num_acts


# ----------------------------------------------------------------------------
# Wrapper: batch-parallel grid, raw f32 input, direct (B, num_acts) output.
# ----------------------------------------------------------------------------
def agent_network_fc_forward(x, w_stack, b_stack, num_acts):
    """x: (B, obs_dim + obs_u_dim) f32.  Returns (B, num_acts) f32 logits."""
    B, F = x.shape
    L, P, _ = w_stack.shape

    TB = _choose_batch_tile(B)
    grid = (_cdiv(B, TB),)              # last block masked by Pallas if ragged

    return pl.pallas_call(
        agent_network_fc_kernel,
        out_shape=jax.ShapeDtypeStruct((B, num_acts), jnp.float32),
        grid_spec=pltpu.PrefetchScalarGridSpec(
            num_scalar_prefetch=0,
            grid=grid,
            in_specs=[
                pl.BlockSpec((TB, F), lambda i: (i, 0)),        # x tile (f32)
                pl.BlockSpec((L, P, P), lambda i: (0, 0, 0)),   # weights (resident)
                pl.BlockSpec((L, 1, P), lambda i: (0, 0, 0)),   # biases (resident)
            ],
            out_specs=pl.BlockSpec((TB, num_acts), lambda i: (i, 0)),
        ),
        compiler_params=pltpu.CompilerParams(
            dimension_semantics=("parallel",)),
    )(x, w_stack, b_stack)


# ----------------------------------------------------------------------------
# Init + plain-JAX f32 reference (unfused chain) for correctness checking.
# ----------------------------------------------------------------------------
def init_linear(key, in_dim, out_dim):
    """PyTorch-style init U(-1/sqrt(in), 1/sqrt(in)); W stored transposed."""
    kw, kb = jax.random.split(key)
    bound = 1.0 / (in_dim ** 0.5)
    w_t = jax.random.uniform(kw, (in_dim, out_dim), jnp.float32, -bound, bound)
    b = jax.random.uniform(kb, (1, out_dim), jnp.float32, -bound, bound)
    return w_t, b


def reference_forward(x, params):
    relu_after = [True, True, False, True, True, False, False]
    h = x
    for (w, b), r in zip(params, relu_after):
        h = h @ w + b
        if r:
            h = jnp.maximum(h, 0.0)
    return h


if __name__ == "__main__":
    # Small shapes consistent with the module's constructor.
    obs_dim, obs_u_dim = 24, 8
    mid_dim1, mid_dim2 = 32, 32
    gnn_hdim1, gnn_hdim2, gnn_out_dim = 32, 32, 32
    num_acts = 16

    key = jax.random.PRNGKey(0)
    keys = jax.random.split(key, 11)

    layer_dims = [
        (obs_dim + obs_u_dim, mid_dim1),   # linear_obs_rep[0]
        (mid_dim1, mid_dim2),              # linear_obs_rep[2]
        (mid_dim2, mid_dim2),              # linear_obs_rep[4]
        (mid_dim2, gnn_hdim1),             # gnn[0]
        (gnn_hdim1, gnn_hdim2),            # gnn[2]
        (gnn_hdim2, gnn_out_dim),          # gnn[4]
        (gnn_out_dim, num_acts),           # act_logits
    ]
    params = [init_linear(k, i, o) for k, (i, o) in zip(keys[:7], layer_dims)]
    # TODO(synk): v_compute (Linear(gnn_out_dim, 1)) is defined in __init__ but
    # unused in forward(), so it is intentionally not materialized here.

    w_stack, b_stack, na = prepare_packed_params(params)

    # Batch sizes exercising: single tiny tile (8), ragged last block (200),
    # exact 2-step parallel grid (256), and the large 512-row tile path (1024).
    for batch, kx in ((8, keys[7]), (200, keys[8]), (256, keys[9]), (1024, keys[10])):
        x = jax.random.normal(kx, (batch, obs_dim + obs_u_dim), jnp.float32)
        logits = agent_network_fc_forward(x, w_stack, b_stack, na)
        jax.block_until_ready(logits)

        ref = reference_forward(x, params)
        assert logits.shape == (batch, num_acts)
        # bf16 MXU inputs + layer fusion => small reassociation/rounding diffs.
        assert jnp.allclose(logits, ref, atol=5e-2, rtol=5e-2)

    print("KERNEL_OK")
</pallas_src>

<mosaic_0001>
module attributes {stable_mosaic.version = 11 : i64} {
  func.func @agent_network_fc_kernel(%arg0: i32, %arg1: memref<8x32xf32, #tpu.memory_space<vmem>>, %arg2: memref<5x128x128xbf16, #tpu.memory_space<vmem>>, %arg3: memref<5x1x128xf32, #tpu.memory_space<vmem>>, %arg4: memref<8x16xf32, #tpu.memory_space<vmem>>) attributes {dimension_semantics = [#tpu.dimension_semantics<parallel>], iteration_bounds = array<i64: 1>, scalar_prefetch = 0 : i64, scratch_operands = 0 : i64, tpu.core_type = #tpu.core_type<tc>, window_params = [{transform_indices = @transform_0, window_bounds = array<i64: 8, 32>}, {pipeline_mode = #tpu.pipeline_mode<synchronous>, transform_indices = @transform_1, window_bounds = array<i64: 5, 128, 128>}, {pipeline_mode = #tpu.pipeline_mode<synchronous>, transform_indices = @transform_2, window_bounds = array<i64: 5, 1, 128>}, {transform_indices = @transform_3, window_bounds = array<i64: 8, 16>}]} {
    %c0 = arith.constant 0 : index
    %c0_0 = arith.constant 0 : index
    %0 = vector.load %arg1[%c0, %c0_0] : memref<8x32xf32, #tpu.memory_space<vmem>>, vector<8x32xf32>
    %1 = arith.truncf %0 : vector<8x32xf32> to vector<8x32xbf16>
    %c0_1 = arith.constant 0 : index
    %c0_2 = arith.constant 0 : index
    %c0_3 = arith.constant 0 : index
    %2 = vector.load %arg2[%c0_1, %c0_2, %c0_3] : memref<5x128x128xbf16, #tpu.memory_space<vmem>>, vector<1x128x128xbf16>
    %3 = vector.shape_cast %2 : vector<1x128x128xbf16> to vector<128x128xbf16>
    %4 = vector.extract_strided_slice %3 {offsets = [0, 0], sizes = [32, 128], strides = [1, 1]} : vector<128x128xbf16> to vector<32x128xbf16>
    %c0_4 = arith.constant 0 : index
    %c0_5 = arith.constant 0 : index
    %c0_6 = arith.constant 0 : index
    %5 = vector.load %arg3[%c0_4, %c0_5, %c0_6] : memref<5x1x128xf32, #tpu.memory_space<vmem>>, vector<1x1x128xf32>
    %6 = vector.shape_cast %5 : vector<1x1x128xf32> to vector<1x128xf32>
    %cst = arith.constant dense<0.000000e+00> : vector<8x128xf32>
    %7 = tpu.matmul %1, %4, %cst {dimension_numbers = #tpu.dot_dimension_numbers<[1], [0], [0], [1], [0, 0, 1, 1], [], []>} : vector<8x32xbf16>, vector<32x128xbf16>, vector<8x128xf32> -> vector<8x128xf32>
    %8 = vector.broadcast %6 : vector<1x128xf32> to vector<8x128xf32>
    %9 = arith.addf %7, %8 : vector<8x128xf32>
    %cst_7 = arith.constant 0.000000e+00 : f32
    %10 = vector.broadcast %cst_7 : f32 to vector<8x128xf32>
    %11 = arith.maximumf %9, %10 : vector<8x128xf32>
    %12 = arith.truncf %11 : vector<8x128xf32> to vector<8x128xbf16>
    %c1 = arith.constant 1 : index
    %c0_8 = arith.constant 0 : index
    %c0_9 = arith.constant 0 : index
    %13 = vector.load %arg2[%c1, %c0_8, %c0_9] : memref<5x128x128xbf16, #tpu.memory_space<vmem>>, vector<1x128x128xbf16>
    %14 = vector.shape_cast %13 : vector<1x128x128xbf16> to vector<128x128xbf16>
    %c1_10 = arith.constant 1 : index
    %c0_11 = arith.constant 0 : index
    %c0_12 = arith.constant 0 : index
    %15 = vector.load %arg3[%c1_10, %c0_11, %c0_12] : memref<5x1x128xf32, #tpu.memory_space<vmem>>, vector<1x1x128xf32>
    %16 = vector.shape_cast %15 : vector<1x1x128xf32> to vector<1x128xf32>
    %cst_13 = arith.constant dense<0.000000e+00> : vector<8x128xf32>
    %17 = tpu.matmul %12, %14, %cst_13 {dimension_numbers = #tpu.dot_dimension_numbers<[1], [0], [0], [1], [0, 0, 1, 1], [], []>} : vector<8x128xbf16>, vector<128x128xbf16>, vector<8x128xf32> -> vector<8x128xf32>
    %18 = vector.broadcast %16 : vector<1x128xf32> to vector<8x128xf32>
    %19 = arith.addf %17, %18 : vector<8x128xf32>
    %cst_14 = arith.constant 0.000000e+00 : f32
    %20 = vector.broadcast %cst_14 : f32 to vector<8x128xf32>
    %21 = arith.maximumf %19, %20 : vector<8x128xf32>
    %22 = arith.truncf %21 : vector<8x128xf32> to vector<8x128xbf16>
    %c2 = arith.constant 2 : index
    %c0_15 = arith.constant 0 : index
    %c0_16 = arith.constant 0 : index
    %23 = vector.load %arg2[%c2, %c0_15, %c0_16] : memref<5x128x128xbf16, #tpu.memory_space<vmem>>, vector<1x128x128xbf16>
    %24 = vector.shape_cast %23 : vector<1x128x128xbf16> to vector<128x128xbf16>
    %c2_17 = arith.constant 2 : index
    %c0_18 = arith.constant 0 : index
    %c0_19 = arith.constant 0 : index
    %25 = vector.load %arg3[%c2_17, %c0_18, %c0_19] : memref<5x1x128xf32, #tpu.memory_space<vmem>>, vector<1x1x128xf32>
    %26 = vector.shape_cast %25 : vector<1x1x128xf32> to vector<1x128xf32>
    %cst_20 = arith.constant dense<0.000000e+00> : vector<8x128xf32>
    %27 = tpu.matmul %22, %24, %cst_20 {dimension_numbers = #tpu.dot_dimension_numbers<[1], [0], [0], [1], [0, 0, 1, 1], [], []>} : vector<8x128xbf16>, vector<128x128xbf16>, vector<8x128xf32> -> vector<8x128xf32>
    %28 = vector.broadcast %26 : vector<1x128xf32> to vector<8x128xf32>
    %29 = arith.addf %27, %28 : vector<8x128xf32>
    %cst_21 = arith.constant 0.000000e+00 : f32
    %30 = vector.broadcast %cst_21 : f32 to vector<8x128xf32>
    %31 = arith.maximumf %29, %30 : vector<8x128xf32>
    %32 = arith.truncf %31 : vector<8x128xf32> to vector<8x128xbf16>
    %c3 = arith.constant 3 : index
    %c0_22 = arith.constant 0 : index
    %c0_23 = arith.constant 0 : index
    %33 = vector.load %arg2[%c3, %c0_22, %c0_23] : memref<5x128x128xbf16, #tpu.memory_space<vmem>>, vector<1x128x128xbf16>
    %34 = vector.shape_cast %33 : vector<1x128x128xbf16> to vector<128x128xbf16>
    %c3_24 = arith.constant 3 : index
    %c0_25 = arith.constant 0 : index
    %c0_26 = arith.constant 0 : index
    %35 = vector.load %arg3[%c3_24, %c0_25, %c0_26] : memref<5x1x128xf32, #tpu.memory_space<vmem>>, vector<1x1x128xf32>
    %36 = vector.shape_cast %35 : vector<1x1x128xf32> to vector<1x128xf32>
    %cst_27 = arith.constant dense<0.000000e+00> : vector<8x128xf32>
    %37 = tpu.matmul %32, %34, %cst_27 {dimension_numbers = #tpu.dot_dimension_numbers<[1], [0], [0], [1], [0, 0, 1, 1], [], []>} : vector<8x128xbf16>, vector<128x128xbf16>, vector<8x128xf32> -> vector<8x128xf32>
    %38 = vector.broadcast %36 : vector<1x128xf32> to vector<8x128xf32>
    %39 = arith.addf %37, %38 : vector<8x128xf32>
    %cst_28 = arith.constant 0.000000e+00 : f32
    %40 = vector.broadcast %cst_28 : f32 to vector<8x128xf32>
    %41 = arith.maximumf %39, %40 : vector<8x128xf32>
    %42 = arith.truncf %41 : vector<8x128xf32> to vector<8x128xbf16>
    %c4 = arith.constant 4 : index
    %c0_29 = arith.constant 0 : index
    %c0_30 = arith.constant 0 : index
    %43 = vector.load %arg2[%c4, %c0_29, %c0_30] : memref<5x128x128xbf16, #tpu.memory_space<vmem>>, vector<1x128x128xbf16>
    %44 = vector.shape_cast %43 : vector<1x128x128xbf16> to vector<128x128xbf16>
    %c4_31 = arith.constant 4 : index
    %c0_32 = arith.constant 0 : index
    %c0_33 = arith.constant 0 : index
    %45 = vector.load %arg3[%c4_31, %c0_32, %c0_33] : memref<5x1x128xf32, #tpu.memory_space<vmem>>, vector<1x1x128xf32>
    %46 = vector.shape_cast %45 : vector<1x1x128xf32> to vector<1x128xf32>
    %cst_34 = arith.constant dense<0.000000e+00> : vector<8x128xf32>
    %47 = tpu.matmul %42, %44, %cst_34 {dimension_numbers = #tpu.dot_dimension_numbers<[1], [0], [0], [1], [0, 0, 1, 1], [], []>} : vector<8x128xbf16>, vector<128x128xbf16>, vector<8x128xf32> -> vector<8x128xf32>
    %48 = vector.broadcast %46 : vector<1x128xf32> to vector<8x128xf32>
    %49 = arith.addf %47, %48 : vector<8x128xf32>
    %50 = vector.extract_strided_slice %49 {offsets = [0, 0], sizes = [8, 16], strides = [1, 1]} : vector<8x128xf32> to vector<8x16xf32>
    %c0_35 = arith.constant 0 : index
    %c0_36 = arith.constant 0 : index
    %51 = vector.load %arg4[%c0_35, %c0_36] : memref<8x16xf32, #tpu.memory_space<vmem>>, vector<8x16xf32>
    tpu.vector_store %arg4[%c0_35, %c0_36], %50 {strides = array<i32>} : memref<8x16xf32, #tpu.memory_space<vmem>>, vector<8x16xf32>,
    return
  }
  func.func @transform_0(%arg0: i32) -> (i32, i32) {
    %c0_i32 = arith.constant 0 : i32
    %c0_i32_0 = arith.constant 0 : i32
    return %arg0, %c0_i32 : i32, i32
  }
  func.func @transform_1(%arg0: i32) -> (i32, i32, i32) {
    %c0_i32 = arith.constant 0 : i32
    %c0_i32_0 = arith.constant 0 : i32
    %c0_i32_1 = arith.constant 0 : i32
    %c0_i32_2 = arith.constant 0 : i32
    return %c0_i32, %c0_i32_0, %c0_i32_1 : i32, i32, i32
  }
  func.func @transform_2(%arg0: i32) -> (i32, i32, i32) {
    %c0_i32 = arith.constant 0 : i32
    %c0_i32_0 = arith.constant 0 : i32
    %c0_i32_1 = arith.constant 0 : i32
    %c0_i32_2 = arith.constant 0 : i32
    return %c0_i32, %c0_i32_0, %c0_i32_1 : i32, i32, i32
  }
  func.func @transform_3(%arg0: i32) -> (i32, i32) {
    %c0_i32 = arith.constant 0 : i32
    %c0_i32_0 = arith.constant 0 : i32
    return %arg0, %c0_i32 : i32, i32
  }
}

</mosaic_0001>

<bundles_post_ra>
// kernel: tpu_custom_call.1
= control target key start
LH: loop header
LB: loop body
LE: loop exit
PB: predicated region body
PF: predicated region fallthrough
CT: control target
= control target key end

     0   :  { %8 = vsyncpa [#allocation3], 0  ;;  %s1002_s0 = inlined_call_operand.hbm [shape: f32[8,32], index: 0, kind: input, shape index: {}]   ;;  %s1003_s1 = inlined_call_operand.hbm [shape: bf16[5,128,128], index: 1, kind: input, shape index: {}]   ;;  %s1004_s2 = inlined_call_operand.vmem [shape: f32[5,1,128], index: 2, kind: input, shape index: {}]   ;;  %s1005_s3 = inlined_call_operand.hbm [shape: f32[8,16], index: 3, kind: output, shape index: {}]  }
   0x1   :  { %9 = vsyncpa [#allocation6], 0 }
   0x2   :  { %10 = vsyncpa [#allocation4], 0  ;;  %s873_s12 = smov [#allocation2]   ;;  %s874_s14 = smov [#allocation5]  }
   0x3   :  { %s17_s13 = sshll.u32 %s873_s12, 4  ;;  %s26_s15 = sshll.u32 %s874_s14, 4  ;;  %s18_s13 = int_to_ptr.vmem [resolvable:$true] %s17_s13  ;;  %s900_s15 = int_to_ptr.vmem [resolvable:$true] %s26_s15 }
   0x4   :  { %s801_s18 = scalar_lea.hbm %s1002_s0, 128 }
   0x5   :  { %p802_p0 = scmp.ne.s32.totalorder %s1002_s0, %s801_s18  ;;  %p805_p1 = scmp.lt.u32.totalorder %s801_s18, %s1002_s0 }
   0x7   :  { %p807_p2 = pnand %p805_p1, %p802_p0 }
   0x9   :  { %810 = shalt.err (!%p807_p2)
}
   0xa   :  { %s811_s23 = scalar_lea.vmem %s18_s13, 128  ;;  %p816_p4 = scmp.lt.s32.totalorder %s18_s13, %s18_s13 }
   0xb   :  { %p812_p3 = scmp.ne.s32.totalorder %s18_s13, %s811_s23  ;;  %p817_p5 = scmp.lt.s32.totalorder %s811_s23, %s811_s23 }
   0xd   :  { %p818_p6 = por %p817_p5, %p816_p4 }
   0xf   :  { %p819_p7 = pnand %p818_p6, %p812_p3 }
  0x11   :  { %822 = shalt.err (!%p819_p7)
}
  0x12   :  { %20 = dma.hbm_to_vmem [thread:$0]  %s1002_s0, 128, %s18_s13, [#allocation3]  }
  0x13   :  { %s823_s28 = scalar_lea.hbm %s1003_s1, 5120 }
  0x14   :  { %p824_p8 = scmp.ne.s32.totalorder %s1003_s1, %s823_s28  ;;  %p827_p9 = scmp.lt.u32.totalorder %s823_s28, %s1003_s1 }
  0x16   :  { %p829_p10 = pnand %p827_p9, %p824_p8 }
  0x18   :  { %832 = shalt.err (!%p829_p10)
}
  0x19   :  { %s833_s6 = scalar_lea.vmem %s900_s15, 5120  ;;  %p838_p12 = scmp.lt.s32.totalorder %s900_s15, %s900_s15 }
  0x1a   :  { %p834_p11 = scmp.ne.s32.totalorder %s900_s15, %s833_s6  ;;  %p839_p13 = scmp.lt.s32.totalorder %s833_s6, %s833_s6 }
  0x1c   :  { %p840_p0 = por %p839_p13, %p838_p12 }
  0x1e   :  { %p841_p1 = pnand %p840_p0, %p834_p11 }
  0x20   :  { %844 = shalt.err (!%p841_p1)
}
  0x21   :  { %s875_s0 = smov 64   ;;  %s876_s7 = smov 4  }
  0x22   :  { %32 = dma.hbm_to_vmem [thread:$0]  %s1003_s1, 5120, %s900_s15, [#allocation6], %s875_s0, %s875_s0, %s876_s7  }
  0x23   :  { %867 = dma.done.wait [#allocation3], 128  }
  0x24   :  { %868 = vsyncadd [#allocation3], 4294967168 }
  0x25   :  { %869 = dma.done.wait [#allocation6], 5120  }
  0x26   :  { %870 = vsyncadd [#allocation6], 4294962176  ;;  %v877_v0 = vmov 0.0   ;;  %vm878_vm0 = vmmov 0   ;;  %v767_v1 = vld [vmem:[#allocation5] sm:$0xff]   ;;  %v768_v2 = vld [vmem:[#allocation5 + $0x8] sm:$0xff]  }
  0x27   :  { %672 = vmatprep.subr.bf16.mxu0 %v877_v0  ;;  %676 = vmatprep.mubr.msk.bf16.mxu0 %vm878_vm0, %v877_v0  ;;  %v42_v3 = vld [vmem:[#allocation2] sm:$0xff]  ;;  %v769_v4 = vld [vmem:[#allocation5 + $0x40] sm:$0xff]   ;;  %v770_v6 = vld [vmem:[#allocation5 + $0x48] sm:$0xff]   ;;  %vm67_vm1 = vcmask 261120   ;;  %s879_s19 = smov [#allocation7]   ;;  %vm571_vm2 = vcmask 130048  }
  0x28   :  { %680 = vmatprep.subr.bf16.mxu1 %v877_v0  ;;  %696 = vmatprep.mubr.msk.bf16.mxu1 %vm878_vm0, %v877_v0  ;;  %v43_v5 = vpack.c.bf16 %v42_v3, %v42_v3  ;;  %v771_v7 = vld [vmem:[#allocation5 + $0x50] sm:$0xff]   ;;  %v772_v8 = vld [vmem:[#allocation5 + $0x58] sm:$0xff]   ;;  %v773_v9 = vld [vmem:[#allocation5 + $0x60] sm:$0xff]   ;;  %s579_s20 = sshll.u32 %s879_s19, 4  ;;  %s580_s20 = int_to_ptr.vmem [resolvable:$true] %s579_s20 }
  0x29   :  { %673 = vmatpush3.bf16.msra.mxu0 %v767_v1  ;;  %681 = vmatpush3.bf16.msra.mxu1 %v769_v4  ;;  %v774_v10 = vld [vmem:[#allocation5 + $0x68] sm:$0xff]   ;;  %v775_v11 = vld [vmem:[#allocation5 + $0x70] sm:$0xff]   ;;  %v776_v12 = vld [vmem:[#allocation5 + $0x78] sm:$0xff]   ;;  %s845_s21 = scalar_lea.vmem %s580_s20, 128  ;;  %p850_p3 = scmp.lt.s32.totalorder %s580_s20, %s580_s20 }
  0x2a   :  { %674 = vmatprep.subr.bf16.mxu0 %v877_v0  ;;  %682 = vmatprep.subr.bf16.mxu1 %v877_v0  ;;  %v777_v13 = vld [vmem:[#allocation5 + $0x80] sm:$0xff]   ;;  %v778_v14 = vld [vmem:[#allocation5 + $0x88] sm:$0xff]   ;;  %v779_v15 = vld [vmem:[#allocation5 + $0x90] sm:$0xff]   ;;  %p846_p2 = scmp.ne.s32.totalorder %s580_s20, %s845_s21  ;;  %p851_p4 = scmp.lt.s32.totalorder %s845_s21, %s845_s21 }
  0x2b   :  { %v780_v16 = vld [vmem:[#allocation5 + $0x98] sm:$0xff]   ;;  %v781_v17 = vld [vmem:[#allocation5 + $0xa0] sm:$0xff]   ;;  %v782_v18 = vld [vmem:[#allocation5 + $0xa8] sm:$0xff]  }
  0x2c   :  { %v589_v19 = vld [vmem:[%s1004_s2] ss:$0 sm:$0xff]  ;;  %v783_v27 = vld [vmem:[#allocation5 + $0xb0] sm:$0xff]   ;;  %v785_v29 = vld [vmem:[#allocation5 + $0xc0] sm:$0xff]   ;;  %p852_p5 = por %p851_p4, %p850_p3 }
  0x2d   :  { %675 = vmatpush3.bf16.msra.mxu0 %v768_v2  ;;  %683 = vmatpush3.bf16.msra.mxu1 %v770_v6  ;;  %v784_v28 = vld [vmem:[#allocation5 + $0xb8] sm:$0xff]   ;;  %v786_v30 = vld [vmem:[#allocation5 + $0xc8] sm:$0xff]   ;;  %v787_v31 = vld [vmem:[#allocation5 + $0xd0] sm:$0xff]  }
  0x2e   :  { %700 = vmatprep.subr.bf16.mxu0 %v877_v0  ;;  %684 = vmatprep.subr.bf16.mxu1 %v877_v0  ;;  %v788_v32 = vld [vmem:[#allocation5 + $0xd8] sm:$0xff]   ;;  %v789_v33 = vld [vmem:[#allocation5 + $0xe0] sm:$0xff]   ;;  %v790_v34 = vld [vmem:[#allocation5 + $0xe8] sm:$0xff]   ;;  %p853_p6 = pnand %p852_p5, %p846_p2 }
  0x2f   :  { %v594_v35 = vld [vmem:[%s1004_s2 + $0x1] ss:$0 sm:$0xff]  ;;  %v791_v43 = vld [vmem:[#allocation5 + $0xf0] sm:$0xff]   ;;  %v793_v45 = vld [vmem:[#allocation5 + $0x100] sm:$0xff]  }
  0x30   :  { %677 = vmatmul.mubr.msk.bf16.vlgmr.msra.gmra.mrb[0].mxu0 %vm67_vm1, %v43_v5  ;;  %v792_v44 = vld [vmem:[#allocation5 + $0xf8] sm:$0xff]   ;;  %v794_v46 = vld [vmem:[#allocation5 + $0x108] sm:$0xff]   ;;  %v795_v47 = vld [vmem:[#allocation5 + $0x110] sm:$0xff]  }
  0x31   :  { %716 = vmatprep.mubr.msk.bf16.mxu0 %vm878_vm0, %v877_v0  ;;  %685 = vmatpush3.bf16.msra.mxu1 %v771_v7  ;;  %v796_v48 = vld [vmem:[#allocation5 + $0x118] sm:$0xff]   ;;  %v797_v49 = vld [vmem:[#allocation5 + $0x120] sm:$0xff]   ;;  %v798_v50 = vld [vmem:[#allocation5 + $0x128] sm:$0xff]  }
  0x32   :  { %686 = vmatprep.subr.bf16.mxu1 %v877_v0  ;;  %701 = vmatpush3.bf16.msra.mxu0 %v777_v13  ;;  %v604_v51 = vld [vmem:[%s1004_s2 + $0x2] ss:$0 sm:$0xff]  ;;  %v799_v59 = vld [vmem:[#allocation5 + $0x130] sm:$0xff]   ;;  %v614_v61 = vld [vmem:[%s1004_s2 + $0x3] ss:$0 sm:$0xff] }
  0x33   :  { %702 = vmatprep.subr.bf16.mxu0 %v877_v0  ;;  %v800_v60 = vld [vmem:[#allocation5 + $0x138] sm:$0xff]  }
  0x34   :  { %v624_v6 = vld [vmem:[%s1004_s2 + $0x4] ss:$0 sm:$0xff] }
  0x35   :  { %687 = vmatpush3.bf16.msra.mxu1 %v772_v8 }
  0x36   :  { %688 = vmatprep.subr.bf16.mxu1 %v877_v0  ;;  %703 = vmatpush3.bf16.msra.mxu0 %v778_v14 }
  0x37   :  { %704 = vmatprep.subr.bf16.mxu0 %v877_v0 }
  0x39   :  { %689 = vmatpush3.bf16.msra.mxu1 %v773_v9 }
  0x3a   :  { %690 = vmatprep.subr.bf16.mxu1 %v877_v0  ;;  %705 = vmatpush3.bf16.msra.mxu0 %v779_v15 }
  0x3b   :  { %706 = vmatprep.subr.bf16.mxu0 %v877_v0 }
  0x3d   :  { %691 = vmatpush3.bf16.msra.mxu1 %v774_v10 }
  0x3e   :  { %692 = vmatprep.subr.bf16.mxu1 %v877_v0  ;;  %707 = vmatpush3.bf16.msra.mxu0 %v780_v16 }
  0x3f   :  { %708 = vmatprep.subr.bf16.mxu0 %v877_v0 }
  0x41   :  { %693 = vmatpush3.bf16.msra.mxu1 %v775_v11 }
  0x42   :  { %694 = vmatprep.subr.bf16.mxu1 %v877_v0  ;;  %709 = vmatpush3.bf16.msra.mxu0 %v781_v17 }
  0x43   :  { %710 = vmatprep.subr.bf16.mxu0 %v877_v0 }
  0x45   :  { %695 = vmatpush3.bf16.msra.mxu1 %v776_v12 }
  0x46   :  { %720 = vmatprep.subr.bf16.mxu1 %v877_v0  ;;  %711 = vmatpush3.bf16.msra.mxu0 %v782_v18 }
  0x47   :  { %712 = vmatprep.subr.bf16.mxu0 %v877_v0 }
  0x4a   :  { %713 = vmatpush3.bf16.msra.mxu0 %v783_v27 }
  0x4b   :  { %714 = vmatprep.subr.bf16.mxu0 %v877_v0 }
  0x4e   :  { %715 = vmatpush3.bf16.msra.mxu0 %v784_v28 }
  0x4f   :  { %740 = vmatprep.subr.bf16.mxu0 %v877_v0 }
 0x103   :  { %v105_v20 = vpop.f32.mrb[0].mxu0 }
 0x104   :  { %v106_v21 = vadd.f32 %v589_v19, %v105_v20  ;;  %v678_v22 = vpop.f32.mrb[1].mxu0 }
 0x105   :  { %v108_v23 = vpop.f32.mrb[2].mxu0 }
 0x106   :  { %v111_v24 = vmax.f32 %v106_v21, 0.0  ;;  %v679_v25 = vpop.f32.mrb[3].mxu0 }
 0x108   :  { %v112_v26 = vpack.c.bf16 %v111_v24, %v111_v24 }
 0x10a   :  { %697 = vmatmul.mubr.bf16.vlgmr.msra.gmra.mrb[0].mxu1 %v112_v26 }
 0x10b   :  { %736 = vmatprep.mubr.msk.bf16.mxu1 %vm878_vm0, %v877_v0  ;;  %721 = vmatpush3.bf16.msra.mxu1 %v785_v29 }
 0x10c   :  { %722 = vmatprep.subr.bf16.mxu1 %v877_v0 }
 0x10f   :  { %723 = vmatpush3.bf16.msra.mxu1 %v786_v30 }
 0x110   :  { %724 = vmatprep.subr.bf16.mxu1 %v877_v0 }
 0x113   :  { %725 = vmatpush3.bf16.msra.mxu1 %v787_v31 }
 0x114   :  { %726 = vmatprep.subr.bf16.mxu1 %v877_v0 }
 0x117   :  { %727 = vmatpush3.bf16.msra.mxu1 %v788_v32 }
 0x118   :  { %728 = vmatprep.subr.bf16.mxu1 %v877_v0 }
 0x11b   :  { %729 = vmatpush3.bf16.msra.mxu1 %v789_v33 }
 0x11c   :  { %730 = vmatprep.subr.bf16.mxu1 %v877_v0 }
 0x11f   :  { %731 = vmatpush3.bf16.msra.mxu1 %v790_v34 }
 0x120   :  { %732 = vmatprep.subr.bf16.mxu1 %v877_v0 }
 0x123   :  { %733 = vmatpush3.bf16.msra.mxu1 %v791_v43 }
 0x124   :  { %734 = vmatprep.subr.bf16.mxu1 %v877_v0 }
 0x127   :  { %735 = vmatpush3.bf16.msra.mxu1 %v792_v44 }
 0x1dd   :  { %v220_v36 = vpop.f32.mrb[0].mxu1 }
 0x1de   :  { %v221_v37 = vadd.f32 %v594_v35, %v220_v36  ;;  %v698_v38 = vpop.f32.mrb[1].mxu1 }
 0x1df   :  { %v223_v39 = vpop.f32.mrb[2].mxu1 }
 0x1e0   :  { %v226_v40 = vmax.f32 %v221_v37, 0.0  ;;  %v699_v41 = vpop.f32.mrb[3].mxu1 }
 0x1e2   :  { %v227_v42 = vpack.c.bf16 %v226_v40, %v226_v40 }
 0x1e4   :  { %717 = vmatmul.mubr.bf16.vlgmr.msra.gmra.mrb[4].mxu0 %v227_v42 }
 0x1e5   :  { %756 = vmatprep.mubr.msk.bf16.mxu0 %vm878_vm0, %v877_v0  ;;  %741 = vmatpush3.bf16.msra.mxu0 %v793_v45 }
 0x1e6   :  { %742 = vmatprep.subr.bf16.mxu0 %v877_v0 }
 0x1e9   :  { %743 = vmatpush3.bf16.msra.mxu0 %v794_v46 }
 0x1ea   :  { %744 = vmatprep.subr.bf16.mxu0 %v877_v0 }
 0x1ed   :  { %745 = vmatpush3.bf16.msra.mxu0 %v795_v47 }
 0x1ee   :  { %746 = vmatprep.subr.bf16.mxu0 %v877_v0 }
 0x1f1   :  { %747 = vmatpush3.bf16.msra.mxu0 %v796_v48 }
 0x1f2   :  { %748 = vmatprep.subr.bf16.mxu0 %v877_v0 }
 0x1f5   :  { %749 = vmatpush3.bf16.msra.mxu0 %v797_v49 }
 0x1f6   :  { %750 = vmatprep.subr.bf16.mxu0 %v877_v0 }
 0x1f9   :  { %751 = vmatpush3.bf16.msra.mxu0 %v798_v50 }
 0x1fa   :  { %752 = vmatprep.subr.bf16.mxu0 %v877_v0 }
 0x1fd   :  { %753 = vmatpush3.bf16.msra.mxu0 %v799_v59 }
 0x1fe   :  { %754 = vmatprep.subr.bf16.mxu0 %v877_v0 }
 0x201   :  { %755 = vmatpush3.bf16.msra.mxu0 %v800_v60 }
 0x2b7   :  { %v335_v52 = vpop.f32.mrb[4].mxu0 }
 0x2b8   :  { %v336_v53 = vadd.f32 %v604_v51, %v335_v52  ;;  %v718_v54 = vpop.f32.mrb[5].mxu0 }
 0x2b9   :  { %v338_v55 = vpop.f32.mrb[6].mxu0 }
 0x2ba   :  { %v341_v56 = vmax.f32 %v336_v53, 0.0  ;;  %v719_v57 = vpop.f32.mrb[7].mxu0 }
 0x2bc   :  { %v342_v58 = vpack.c.bf16 %v341_v56, %v341_v56 }
 0x2be   :  { %737 = vmatmul.mubr.bf16.vlgmr.msra.gmra.mrb[4].mxu1 %v342_v58 }
 0x391   :  { %v450_v62 = vpop.f32.mrb[4].mxu1 }
 0x392   :  { %v451_v63 = vadd.f32 %v614_v61, %v450_v62  ;;  %v738_v1 = vpop.f32.mrb[5].mxu1 }
 0x393   :  { %v453_v2 = vpop.f32.mrb[6].mxu1 }
 0x394   :  { %v456_v3 = vmax.f32 %v451_v63, 0.0  ;;  %v739_v4 = vpop.f32.mrb[7].mxu1 }
 0x396   :  { %v457_v5 = vpack.c.bf16 %v456_v3, %v456_v3 }
 0x398   :  { %757 = vmatmul.mubr.bf16.vlgmr.msra.gmra.mrb[8].mxu0 %v457_v5 }
 0x46b   :  { %v565_v0 = vpop.f32.mrb[8].mxu0 }
 0x46c   :  { %v566_v7 = vadd.f32 %v624_v6, %v565_v0  ;;  %v758_v8 = vpop.f32.mrb[9].mxu0 }
 0x46d   :  { %v568_v9 = vpop.f32.mrb[10].mxu0 }
 0x46e   :  { %v759_v10 = vpop.f32.mrb[11].mxu0  ;;  %572 = vst.msk [vmem:[#allocation7] sm:$0xff] %vm571_vm2, %v566_v7 }
 0x46f   :  { %856 = shalt.err (!%p853_p6)
}
 0x470   :  { %s857_s2 = scalar_lea.hbm %s1005_s3, 128 }
 0x471   :  { %p858_p7 = scmp.ne.s32.totalorder %s1005_s3, %s857_s2  ;;  %p861_p8 = scmp.lt.u32.totalorder %s857_s2, %s1005_s3 }
 0x473   :  { %p863_p9 = pnand %p861_p8, %p858_p7 }
 0x475   :  { %866 = shalt.err (!%p863_p9)
}
 0x476   :  { %582 = dma.vmem_to_hbm [thread:$0]  %s580_s20, 128, %s1005_s3, [#allocation4]  }
 0x477   :  { %871 = dma.done.wait [#allocation4], 128  }
 0x478   :  { %872 = vsyncadd [#allocation4], 4294967168 }
 0x479   :  { %586 = vsyncpa [#allocation3], 1 }
 0x47a   :  { %587 = vsyncpa [#allocation6], 1 }
 0x47b   :  { %588 = vsyncpa [#allocation4], 1 }

</bundles_post_ra>
